<compile_context>
chip_gen: v7x
topology: tpu7x:2x2x1
jax: 0.10.0
libtpu: 0.0.40
codegen_flags: <defaults>
</compile_context>

<pallas_src>
import functools

import jax
import jax.numpy as jnp
from jax.experimental import pallas as pl
from jax.experimental.pallas import tpu as pltpu


def gaussnet_kernel(x_ref, w1_ref, b1_ref, w2_ref, b2_ref, w3_ref, b3_ref,
                    mu_ref):
    x = x_ref[...]                                                 # (8, Bblk)
    h1 = jnp.dot(w1_ref[...], x,
                 preferred_element_type=jnp.float32) + b1_ref[...]  # (32, Bblk)
    h1 = jnp.maximum(h1, 0.0)                                       # ReLU (f32 VPU)
    h2 = jnp.dot(w2_ref[...], h1,
                 preferred_element_type=jnp.float32) + b2_ref[...]  # (32, Bblk)
    h2 = jnp.maximum(h2, 0.0)                                       # ReLU
    mu = jnp.dot(w3_ref[...], h2,
                 preferred_element_type=jnp.float32) + b3_ref[...]  # (2, Bblk)
    mu_ref[...] = mu.astype(mu_ref.dtype)


@functools.partial(jax.jit, static_argnames=("block_b", "use_bf16"))
def gaussnet_forward(x, params, *, block_b=512, use_bf16=False):
    """x: (B, 8) float32 -> mu: (B, 2) float32.

    params = (w1 (32,8), b1 (32,1), w2 (32,32), b2 (32,1), w3 (2,32), b3 (2,1))
    stored in PyTorch-native (out_features, in_features) layout.
    """
    w1, b1, w2, b2, w3, b3 = params
    B = x.shape[0]

    # Batch tile on the lane axis: multiple of 128, capped at block_b
    # (block_b=512 already reaches ~85% of HBM roofline; bigger adds nothing).
    Bblk = min(block_b, ((B + 127) // 128) * 128)
    nblk = pl.cdiv(B, Bblk)
    B_pad = nblk * Bblk

    # Layout plumbing in the wrapper: pad the batch to a tile multiple and put
    # it on the last (lane) axis.  Padded columns are computed then sliced off.
    x_t = jnp.zeros((8, B_pad), x.dtype).at[:, :B].set(x.T)

    if use_bf16:
        # MXU operands only; bias add / ReLU stay f32 (no bf16 VPU on v5e).
        x_t = x_t.astype(jnp.bfloat16)
        w1, w2, w3 = (w.astype(jnp.bfloat16) for w in (w1, w2, w3))

    # Weights/biases: constant-index full-block specs -> resident in VMEM.
    def const_spec(arr):
        return pl.BlockSpec(arr.shape, lambda i: (0, 0))

    mu_t = pl.pallas_call(
        gaussnet_kernel,
        out_shape=jax.ShapeDtypeStruct((2, B_pad), jnp.float32),
        grid=(nblk,),
        in_specs=[
            pl.BlockSpec((8, Bblk), lambda i: (0, i)),   # streamed x tile
            const_spec(w1), const_spec(b1),
            const_spec(w2), const_spec(b2),
            const_spec(w3), const_spec(b3),
        ],
        out_specs=pl.BlockSpec((2, Bblk), lambda i: (0, i)),  # lane-dense mu tile
        compiler_params=pltpu.CompilerParams(
            dimension_semantics=("parallel",)),
    )(x_t, w1, b1, w2, b2, w3, b3)

    return mu_t[:, :B].T                                           # (B, 2)


def init_params(key):
    """PyTorch-style uniform(-1/sqrt(fan_in), 1/sqrt(fan_in)); (out,in) layout."""
    def linear(k, fan_in, fan_out):
        kw, kb = jax.random.split(k)
        bound = 1.0 / jnp.sqrt(float(fan_in))
        w = jax.random.uniform(kw, (fan_out, fan_in), jnp.float32,
                               minval=-bound, maxval=bound)
        b = jax.random.uniform(kb, (fan_out, 1), jnp.float32,
                               minval=-bound, maxval=bound)
        return w, b

    k1, k2, k3 = jax.random.split(key, 3)
    w1, b1 = linear(k1, 8, 32)    # affine1
    w2, b2 = linear(k2, 32, 32)   # linear
    w3, b3 = linear(k3, 32, 2)    # affine2
    return (w1, b1, w2, b2, w3, b3)


def reference_forward(x, params):
    w1, b1, w2, b2, w3, b3 = params
    h1 = jnp.maximum(x @ w1.T + b1.T, 0.0)
    h2 = jnp.maximum(h1 @ w2.T + b2.T, 0.0)
    return h2 @ w3.T + b3.T


if __name__ == "__main__":
    key = jax.random.PRNGKey(0)
    kx, kp = jax.random.split(key)
    params = init_params(kp)

    # Small case (B=2): single padded tile.
    B = 2
    x = jax.random.normal(kx, (B, 8), dtype=jnp.float32)
    mu = jax.block_until_ready(gaussnet_forward(x, params))
    ref = reference_forward(x, params)
    assert mu.shape == (B, 2)
    assert jnp.allclose(mu, ref, atol=1e-5, rtol=1e-5)

    # Ragged multi-tile case (B=300, tile 128 -> grid of 3 with tail padding).
    B2 = 300
    x2 = jax.random.normal(jax.random.PRNGKey(1), (B2, 8), dtype=jnp.float32)
    mu2 = jax.block_until_ready(gaussnet_forward(x2, params, block_b=128))
    ref2 = reference_forward(x2, params)
    assert mu2.shape == (B2, 2)
    assert jnp.allclose(mu2, ref2, atol=1e-5, rtol=1e-5)

    print("KERNEL_OK")
</pallas_src>

<mosaic_0001>
module attributes {stable_mosaic.version = 11 : i64} {
  func.func @gaussnet_kernel(%arg0: i32, %arg1: memref<8x128xf32, #tpu.memory_space<vmem>>, %arg2: memref<32x8xf32, #tpu.memory_space<vmem>>, %arg3: memref<32x1xf32, #tpu.memory_space<vmem>>, %arg4: memref<32x32xf32, #tpu.memory_space<vmem>>, %arg5: memref<32x1xf32, #tpu.memory_space<vmem>>, %arg6: memref<2x32xf32, #tpu.memory_space<vmem>>, %arg7: memref<2x1xf32, #tpu.memory_space<vmem>>, %arg8: memref<2x128xf32, #tpu.memory_space<vmem>>) attributes {dimension_semantics = [#tpu.dimension_semantics<parallel>], iteration_bounds = array<i64: 1>, scalar_prefetch = 0 : i64, scratch_operands = 0 : i64, tpu.core_type = #tpu.core_type<tc>, window_params = [{transform_indices = @transform_0, window_bounds = array<i64: 8, 128>}, {pipeline_mode = #tpu.pipeline_mode<synchronous>, transform_indices = @transform_1, window_bounds = array<i64: 32, 8>}, {pipeline_mode = #tpu.pipeline_mode<synchronous>, transform_indices = @transform_2, window_bounds = array<i64: 32, 1>}, {pipeline_mode = #tpu.pipeline_mode<synchronous>, transform_indices = @transform_3, window_bounds = array<i64: 32, 32>}, {pipeline_mode = #tpu.pipeline_mode<synchronous>, transform_indices = @transform_4, window_bounds = array<i64: 32, 1>}, {pipeline_mode = #tpu.pipeline_mode<synchronous>, transform_indices = @transform_5, window_bounds = array<i64: 2, 32>}, {pipeline_mode = #tpu.pipeline_mode<synchronous>, transform_indices = @transform_6, window_bounds = array<i64: 2, 1>}, {transform_indices = @transform_7, window_bounds = array<i64: 2, 128>}]} {
    %c0 = arith.constant 0 : index
    %c0_0 = arith.constant 0 : index
    %0 = vector.load %arg1[%c0, %c0_0] : memref<8x128xf32, #tpu.memory_space<vmem>>, vector<8x128xf32>
    %c0_1 = arith.constant 0 : index
    %c0_2 = arith.constant 0 : index
    %1 = vector.load %arg2[%c0_1, %c0_2] : memref<32x8xf32, #tpu.memory_space<vmem>>, vector<32x8xf32>
    %cst = arith.constant dense<0.000000e+00> : vector<32x128xf32>
    %2 = tpu.matmul %1, %0, %cst {dimension_numbers = #tpu.dot_dimension_numbers<[1], [0], [0], [1], [0, 0, 1, 1], [], []>} : vector<32x8xf32>, vector<8x128xf32>, vector<32x128xf32> -> vector<32x128xf32>
    %c0_3 = arith.constant 0 : index
    %c0_4 = arith.constant 0 : index
    %3 = vector.load %arg3[%c0_3, %c0_4] : memref<32x1xf32, #tpu.memory_space<vmem>>, vector<32x1xf32>
    %4 = vector.broadcast %3 : vector<32x1xf32> to vector<32x128xf32>
    %5 = arith.addf %2, %4 : vector<32x128xf32>
    %cst_5 = arith.constant 0.000000e+00 : f32
    %6 = vector.broadcast %cst_5 : f32 to vector<32x128xf32>
    %7 = arith.maximumf %5, %6 : vector<32x128xf32>
    %c0_6 = arith.constant 0 : index
    %c0_7 = arith.constant 0 : index
    %8 = vector.load %arg4[%c0_6, %c0_7] : memref<32x32xf32, #tpu.memory_space<vmem>>, vector<32x32xf32>
    %cst_8 = arith.constant dense<0.000000e+00> : vector<32x128xf32>
    %9 = tpu.matmul %8, %7, %cst_8 {dimension_numbers = #tpu.dot_dimension_numbers<[1], [0], [0], [1], [0, 0, 1, 1], [], []>} : vector<32x32xf32>, vector<32x128xf32>, vector<32x128xf32> -> vector<32x128xf32>
    %c0_9 = arith.constant 0 : index
    %c0_10 = arith.constant 0 : index
    %10 = vector.load %arg5[%c0_9, %c0_10] : memref<32x1xf32, #tpu.memory_space<vmem>>, vector<32x1xf32>
    %11 = vector.broadcast %10 : vector<32x1xf32> to vector<32x128xf32>
    %12 = arith.addf %9, %11 : vector<32x128xf32>
    %cst_11 = arith.constant 0.000000e+00 : f32
    %13 = vector.broadcast %cst_11 : f32 to vector<32x128xf32>
    %14 = arith.maximumf %12, %13 : vector<32x128xf32>
    %c0_12 = arith.constant 0 : index
    %c0_13 = arith.constant 0 : index
    %15 = vector.load %arg6[%c0_12, %c0_13] : memref<2x32xf32, #tpu.memory_space<vmem>>, vector<2x32xf32>
    %cst_14 = arith.constant dense<0.000000e+00> : vector<2x128xf32>
    %16 = tpu.matmul %15, %14, %cst_14 {dimension_numbers = #tpu.dot_dimension_numbers<[1], [0], [0], [1], [0, 0, 1, 1], [], []>} : vector<2x32xf32>, vector<32x128xf32>, vector<2x128xf32> -> vector<2x128xf32>
    %c0_15 = arith.constant 0 : index
    %c0_16 = arith.constant 0 : index
    %17 = vector.load %arg7[%c0_15, %c0_16] : memref<2x1xf32, #tpu.memory_space<vmem>>, vector<2x1xf32>
    %18 = vector.broadcast %17 : vector<2x1xf32> to vector<2x128xf32>
    %19 = arith.addf %16, %18 : vector<2x128xf32>
    %c0_17 = arith.constant 0 : index
    %c0_18 = arith.constant 0 : index
    %20 = vector.load %arg8[%c0_17, %c0_18] : memref<2x128xf32, #tpu.memory_space<vmem>>, vector<2x128xf32>
    tpu.vector_store %arg8[%c0_17, %c0_18], %19 {strides = array<i32>} : memref<2x128xf32, #tpu.memory_space<vmem>>, vector<2x128xf32>,
    return
  }
  func.func @transform_0(%arg0: i32) -> (i32, i32) {
    %c0_i32 = arith.constant 0 : i32
    %c0_i32_0 = arith.constant 0 : i32
    return %c0_i32, %arg0 : i32, i32
  }
  func.func @transform_1(%arg0: i32) -> (i32, i32) {
    %c0_i32 = arith.constant 0 : i32
    %c0_i32_0 = arith.constant 0 : i32
    %c0_i32_1 = arith.constant 0 : i32
    return %c0_i32, %c0_i32_0 : i32, i32
  }
  func.func @transform_2(%arg0: i32) -> (i32, i32) {
    %c0_i32 = arith.constant 0 : i32
    %c0_i32_0 = arith.constant 0 : i32
    %c0_i32_1 = arith.constant 0 : i32
    return %c0_i32, %c0_i32_0 : i32, i32
  }
  func.func @transform_3(%arg0: i32) -> (i32, i32) {
    %c0_i32 = arith.constant 0 : i32
    %c0_i32_0 = arith.constant 0 : i32
    %c0_i32_1 = arith.constant 0 : i32
    return %c0_i32, %c0_i32_0 : i32, i32
  }
  func.func @transform_4(%arg0: i32) -> (i32, i32) {
    %c0_i32 = arith.constant 0 : i32
    %c0_i32_0 = arith.constant 0 : i32
    %c0_i32_1 = arith.constant 0 : i32
    return %c0_i32, %c0_i32_0 : i32, i32
  }
  func.func @transform_5(%arg0: i32) -> (i32, i32) {
    %c0_i32 = arith.constant 0 : i32
    %c0_i32_0 = arith.constant 0 : i32
    %c0_i32_1 = arith.constant 0 : i32
    return %c0_i32, %c0_i32_0 : i32, i32
  }
  func.func @transform_6(%arg0: i32) -> (i32, i32) {
    %c0_i32 = arith.constant 0 : i32
    %c0_i32_0 = arith.constant 0 : i32
    %c0_i32_1 = arith.constant 0 : i32
    return %c0_i32, %c0_i32_0 : i32, i32
  }
  func.func @transform_7(%arg0: i32) -> (i32, i32) {
    %c0_i32 = arith.constant 0 : i32
    %c0_i32_0 = arith.constant 0 : i32
    return %c0_i32, %arg0 : i32, i32
  }
}

</mosaic_0001>

<bundles_post_ra>
// kernel: gaussnet_forward.1
= control target key start
LH: loop header
LB: loop body
LE: loop exit
PB: predicated region body
PF: predicated region fallthrough
CT: control target
= control target key end

     0   :  { %vm55_vm0 = vcmask 64512   ;;  %v452_v3 = vmov 0   ;;  %vm185_vm1 = vcmask 261120   ;;  %v453_v37 = vmov 0.0|0.0   ;;  %s565_s0 = inlined_call_operand.vmem [shape: f32[8,128], index: 0, kind: input, shape index: {}]   ;;  %s566_s1 = inlined_call_operand.vmem [shape: f32[32,8], index: 1, kind: input, shape index: {}]   ;;  %s567_s2 = inlined_call_operand.vmem [shape: f32[32,1], index: 2, kind: input, shape index: {}]   ;;  %s568_s4 = inlined_call_operand.vmem [shape: f32[32,1], index: 4, kind: input, shape index: {}]   ;;  %s569_s6 = inlined_call_operand.vmem [shape: f32[2,1], index: 6, kind: input, shape index: {}]   ;;  %s570_s3 = inlined_call_operand.vmem [shape: f32[32,32], index: 3, kind: input, shape index: {}]   ;;  %s571_s5 = inlined_call_operand.vmem [shape: f32[2,32], index: 5, kind: input, shape index: {}]   ;;  %s572_s7 = inlined_call_operand.vmem [shape: f32[2,128], index: 7, kind: output, shape index: {}]  }
   0x1   :  { %v26_v0 = vld [vmem:[%s565_s0] sm:$0xff]  ;;  %v28_v2 = vld [vmem:[%s566_s1 + $0x8] sm:$0xff]  ;;  %450 = vset.pattern.permute.xlu0 %v452_v3  ;;  %451 = vset.pattern.permute.xlu1 %v452_v3  ;;  %v29_v4 = vld [vmem:[%s566_s1 + $0x10] sm:$0xff]  ;;  %vm454_vm2 = vmmov 0   ;;  %v455_v38 = vmov 0.0  }
   0x2   :  { %v27_v1 = vld [vmem:[%s566_s1] sm:$0xff]  ;;  %399 = vmatprep.subr.mxu0 %v26_v0  ;;  %v33_v6 = vld [vmem:[%s567_s2 + $0x10] sm:$0xff]  ;;  %v32_v7 = vld [vmem:[%s567_s2 + $0x8] sm:$0xff] }
   0x3   :  { %401 = vmatprep.mubr.msk.f32.mxu0 %vm55_vm0, %v27_v1  ;;  %v31_v5 = vld [vmem:[%s567_s2] sm:$0xff]  ;;  %400 = vmatpush3.msra.mxu0 %v26_v0  ;;  %v30_v8 = vld [vmem:[%s566_s1 + $0x18] sm:$0xff]  ;;  %v162_v11 = vld [vmem:[%s568_s4 + $0x8] sm:$0xff] }
   0x4   :  { %37 = vperm.xlu0 %450, %v31_v5   ;;  %402 = vmatmul.mubr.msk.f32.vlgmr.msra.gmra.mrb[0].mxu0 %vm55_vm0, %v28_v2  ;;  %v34_v9 = vld [vmem:[%s567_s2 + $0x18] sm:$0xff]  ;;  %v161_v10 = vld [vmem:[%s568_s4] sm:$0xff]  ;;  %v163_v12 = vld [vmem:[%s568_s4 + $0x10] sm:$0xff] }
   0x5   :  { %47 = vperm.xlu1 %451, %v33_v6   ;;  %404 = vmatprep.mubr.msk.f32.mxu0 %vm55_vm0, %v29_v4  ;;  %v164_v13 = vld [vmem:[%s568_s4 + $0x18] sm:$0xff]  ;;  %v288_v14 = vld [vmem:[%s569_s6] sm:$0x3]  ;;  %v158_v34 = vld [vmem:[%s570_s3 + $0x8] sm:$0xff] }
   0x6   :  { %v157_v15 = vld [vmem:[%s570_s3] sm:$0xff]  ;;  %v159_v35 = vld [vmem:[%s570_s3 + $0x10] sm:$0xff]  ;;  %v160_v36 = vld [vmem:[%s570_s3 + $0x18] sm:$0xff]  ;;  %440 = vmatprep.subr.bf16.mxu0 %v453_v37 }
   0x7   :  { %415 = vmatprep.mubr.msk.f32.mxu1 %vm185_vm1, %v157_v15  ;;  %v287_v57 = vld [vmem:[%s571_s5] sm:$0x3] }
   0x8   :  { %42 = vperm.xlu0 %450, %v32_v7   ;;  %405 = vmatmul.mubr.msk.f32.gmra.mrb[2].mxu0 %vm55_vm0, %v30_v8 }
   0x9   :  { %52 = vperm.xlu1 %451, %v34_v9   ;;  %429 = vmatprep.mubr.msk.f32.mxu0 %vm454_vm2, %v455_v38 }
   0xc   :  { %167 = vperm.xlu0 %450, %v161_v10  }
   0xd   :  { %172 = vperm.xlu1 %451, %v162_v11  }
  0x10   :  { %177 = vperm.xlu0 %450, %v163_v12  }
  0x11   :  { %182 = vperm.xlu1 %451, %v164_v13  }
  0x14   :  { %291 = vperm.xlu0 %450, %v288_v14  }
  0x83   :  { %v38_v16 = vpop.permute.xlu0 %37 }
  0x84   :  { %v48_v17 = vpop.permute.xlu1 %47 }
  0x87   :  { %v43_v18 = vpop.permute.xlu0 %42 }
  0x88   :  { %v53_v24 = vpop.permute.xlu1 %52 }
  0x8b   :  { %v168_v40 = vpop.permute.xlu0 %167 }
  0x8c   :  { %v173_v39 = vpop.permute.xlu1 %172 }
  0x8f   :  { %v178_v49 = vpop.permute.xlu0 %177 }
  0x90   :  { %v183_v46 = vpop.permute.xlu1 %182 }
  0x93   :  { %v292_v58 = vpop.permute.xlu0 %291 }
  0xd7   :  { %v403_v19 = vpop.f32.mrb[0].mxu0 }
  0xd8   :  { %v140_v20 = vadd.f32 %v403_v19, %v43_v18  ;;  %v134_v21 = vpop.f32.mrb[1].mxu0 }
  0xd9   :  { %v135_v22 = vadd.f32 %v134_v21, %v38_v16 }
  0xda   :  { %v154_v23 = vmax.f32 %v140_v20, 0.0 }
  0xdb   :  { %v153_v25 = vmax.f32 %v135_v22, 0.0  ;;  %v406_v26 = vpop.f32.mrb[2].mxu0 }
  0xdc   :  { %v150_v27 = vadd.f32 %v406_v26, %v53_v24  ;;  %v144_v28 = vpop.f32.mrb[3].mxu0 }
  0xdd   :  { %v145_v29 = vadd.f32 %v144_v28, %v48_v17  ;;  %v432_v30 = vpack.c.bf16 %v154_v23, %v153_v25 }
  0xde   :  { %v156_v31 = vmax.f32 %v150_v27, 0.0 }
  0xdf   :  { %v155_v32 = vmax.f32 %v145_v29, 0.0  ;;  %433 = vmatprep.subr.bf16.mxu1 %v432_v30 }
  0xe0   :  { %435 = vmatpush3.bf16.msra.mxu1 %v432_v30 }
  0xe1   :  { %v436_v33 = vpack.c.bf16 %v156_v31, %v155_v32 }
  0xe3   :  { %437 = vmatprep.subr.bf16.mxu1 %v436_v33 }
  0xe4   :  { %439 = vmatpush3.bf16.msra.mxu1 %v436_v33 }
  0xe7   :  { %416 = vmatmul.mubr.msk.f32.vlgmr.msra.gmra.mrb[0].mxu1 %vm185_vm1, %v158_v34 }
  0xe8   :  { %418 = vmatprep.mubr.msk.f32.mxu1 %vm185_vm1, %v159_v35 }
  0xeb   :  { %419 = vmatmul.mubr.msk.f32.gmra.mrb[2].mxu1 %vm185_vm1, %v160_v36 }
 0x1ba   :  { %v417_v41 = vpop.f32.mrb[0].mxu1 }
 0x1bb   :  { %v270_v42 = vadd.f32 %v417_v41, %v173_v39  ;;  %v264_v43 = vpop.f32.mrb[1].mxu1 }
 0x1bc   :  { %v265_v44 = vadd.f32 %v264_v43, %v168_v40 }
 0x1bd   :  { %v284_v45 = vmax.f32 %v270_v42, 0.0 }
 0x1be   :  { %v283_v47 = vmax.f32 %v265_v44, 0.0  ;;  %v420_v48 = vpop.f32.mrb[2].mxu1 }
 0x1bf   :  { %v280_v50 = vadd.f32 %v420_v48, %v183_v46  ;;  %v274_v51 = vpop.f32.mrb[3].mxu1 }
 0x1c0   :  { %v441_v52 = vpack.c.bf16 %v284_v45, %v283_v47  ;;  %v275_v53 = vadd.f32 %v274_v51, %v178_v49 }
 0x1c1   :  { %v286_v54 = vmax.f32 %v280_v50, 0.0 }
 0x1c2   :  { %v285_v55 = vmax.f32 %v275_v53, 0.0  ;;  %442 = vmatpush3.bf16.msra.mxu0 %v441_v52 }
 0x1c3   :  { %443 = vmatprep.subr.bf16.mxu0 %v453_v37 }
 0x1c4   :  { %v444_v56 = vpack.c.bf16 %v286_v54, %v285_v55 }
 0x1c6   :  { %445 = vmatpush3.bf16.msra.mxu0 %v444_v56 }
 0x1c9   :  { %430 = vmatmul.mubr.msk.f32.vlgmr.msra.gmra.mrb[4].mxu0 %vm185_vm1, %v287_v57 }
 0x29c   :  { %v363_v59 = vpop.f32.mrb[4].mxu0 }
 0x29d   :  { %v364_v60 = vadd.f32 %v363_v59, %v292_v58  ;;  %v431_v61 = vpop.f32.mrb[5].mxu0 }
 0x29f   :  { %367 = vst [vmem:[%s572_s7] sm:$0x3] %v364_v60 }

</bundles_post_ra>
